<compile_context>
chip_gen: v6e
topology: v6e:2x2x1
jax: 0.10.0
libtpu: 0.0.40
codegen_flags: <defaults>
</compile_context>

<pallas_src>
import jax
import jax.numpy as jnp
import numpy as np
from jax.experimental import pallas as pl
from jax.experimental.pallas import tpu as pltpu

# Model hyperparameters (small, consistent with the module's __init__)
BATCH = 2
BLOCK_SIZE = 8          # T  (sequence length / block_size)
EMB = 32                # C  (embedding_dim)
N_HEADS = 4
HEAD_SIZE = EMB // N_HEADS
HIDDEN = 4 * EMB        # FFN hidden dim
EPS = 1e-5              # nn.LayerNorm default eps
NEG_INF = -1e30         # additive mask value (finite -> no inf/NaN corner cases)


def _layernorm_f32(x, gamma, beta):
    mu = jnp.mean(x, axis=-1, keepdims=True)
    var = jnp.mean((x - mu) ** 2, axis=-1, keepdims=True)
    return (x - mu) * jax.lax.rsqrt(var + EPS) * gamma + beta


def block_kernel(x_ref, bias_ref,
                 ln1g_ref, ln1b_ref,
                 wqkv_ref, wproj_ref, bproj_ref,
                 ln2g_ref, ln2b_ref,
                 w1_ref, b1_ref, w2_ref, b2_ref,
                 o_ref):
    # Whole (flattened) batch processed in a single invocation: x is (N, C), N=B*T.
    x = x_ref[...].astype(jnp.float32)
    N, C = x.shape
    D = HEAD_SIZE

    # ---------------- LayerNorm 1 (f32 elementwise) ----------------
    xn = _layernorm_f32(x, ln1g_ref[...], ln1b_ref[...])

    # ---------------- fused QKV projection (1 MXU pass) ----------------
    qkv = jnp.dot(xn.astype(jnp.bfloat16), wqkv_ref[...],
                  preferred_element_type=jnp.float32)            # (N, 3C) f32
    q = qkv[:, 0:C] * (float(D) ** -0.5)                         # scale q once
    k = qkv[:, C:2 * C]
    v = qkv[:, 2 * C:3 * C]

    attn_bias = bias_ref[...]                                    # (N, N): 0 / -1e30
    wproj = wproj_ref[...]                                       # (C, C) bf16

    # Per-head causal attention; the output projection is folded into the
    # per-head accumulation so no lane-axis concatenate is needed.
    sa = jnp.zeros((N, C), jnp.float32)
    for h in range(N_HEADS):
        lo = h * D
        qh = q[:, lo:lo + D].astype(jnp.bfloat16)
        kh = k[:, lo:lo + D].astype(jnp.bfloat16)
        vh = v[:, lo:lo + D].astype(jnp.bfloat16)
        # q @ k^T without materializing the transpose
        wei = jax.lax.dot_general(qh, kh, (((1,), (1,)), ((), ())),
                                  preferred_element_type=jnp.float32)
        wei = wei + attn_bias
        wei = wei - jnp.max(wei, axis=-1, keepdims=True)
        p = jnp.exp(wei)
        p = p * pl.reciprocal(jnp.sum(p, axis=-1, keepdims=True), approx=True)
        pv = jnp.dot(p.astype(jnp.bfloat16), vh,
                     preferred_element_type=jnp.float32)         # (N, D)
        sa = sa + jnp.dot(pv.astype(jnp.bfloat16), wproj[lo:lo + D, :],
                          preferred_element_type=jnp.float32)    # (N, C)
    sa = sa + bproj_ref[...]
    # TODO(synk): dropout is a no-op here (eval mode); no RNG dropout in-kernel.

    x = x + sa                                                   # residual 1

    # ---------------- LayerNorm 2 ----------------
    xn2 = _layernorm_f32(x, ln2g_ref[...], ln2b_ref[...])

    # ---------------- FeedForward ----------------
    h1 = jnp.dot(xn2.astype(jnp.bfloat16), w1_ref[...],
                 preferred_element_type=jnp.float32) + b1_ref[...]
    h1 = jnp.maximum(h1, 0.0)                                    # ReLU in f32
    ff = jnp.dot(h1.astype(jnp.bfloat16), w2_ref[...],
                 preferred_element_type=jnp.float32) + b2_ref[...]

    # NOTE: output last dim is C=32 (<128) so this is a masked store; presenting
    # the output lane-dense as (B, T*C) would need a lane-changing in-kernel
    # reshape — not worth the lowering risk for a 2 KiB output.
    o_ref[...] = (x + ff).astype(o_ref.dtype)


@jax.jit
def decoder_block(x, params):
    B, T, C = x.shape
    N = B * T
    x2 = x.reshape(N, C)

    # Fuse QKV weights; cast matmul weights to bf16 (f32 accumulation in-kernel).
    wqkv = jnp.concatenate(
        [params["wq"], params["wk"], params["wv"]], axis=1).astype(jnp.bfloat16)
    wproj = params["wproj"].astype(jnp.bfloat16)
    w1 = params["w1"].astype(jnp.bfloat16)
    w2 = params["w2"].astype(jnp.bfloat16)

    # Block-diagonal causal mask as a static additive bias (built host-side).
    tri = np.tril(np.ones((T, T), np.float32))
    blk = np.kron(np.eye(B, dtype=np.float32), tri)              # (N, N)
    attn_bias = jnp.asarray(
        np.where(blk > 0, 0.0, NEG_INF).astype(np.float32))

    full = lambda shape: pl.BlockSpec(shape, lambda i: (0,) * len(shape))

    in_specs = [
        full((N, C)),                        # x (whole flattened batch)
        full((N, N)),                        # additive causal bias
        full((1, C)), full((1, C)),          # ln1 gamma / beta
        full((C, 3 * C)),                    # fused Wqkv (bf16)
        full((C, C)), full((1, C)),          # Wproj (bf16), bproj
        full((1, C)), full((1, C)),          # ln2 gamma / beta
        full((C, HIDDEN)), full((1, HIDDEN)),    # W1 (bf16), b1
        full((HIDDEN, C)), full((1, C)),         # W2 (bf16), b2
    ]

    out = pl.pallas_call(
        block_kernel,
        out_shape=jax.ShapeDtypeStruct((N, C), x.dtype),
        grid_spec=pltpu.PrefetchScalarGridSpec(
            num_scalar_prefetch=0,
            grid=(1,),                        # single step: whole problem in VMEM
            in_specs=in_specs,
            out_specs=full((N, C)),
        ),
        compiler_params=pltpu.CompilerParams(
            dimension_semantics=("arbitrary",)),
    )(x2, attn_bias,
      params["ln1_g"], params["ln1_b"],
      wqkv, wproj, params["bproj"],
      params["ln2_g"], params["ln2_b"],
      w1, params["b1"], w2, params["b2"])
    return out.reshape(B, T, C)


def init_params(key):
    ks = jax.random.split(key, 8)
    std = 0.02
    return {
        "ln1_g": jnp.ones((1, EMB), jnp.float32),
        "ln1_b": jnp.zeros((1, EMB), jnp.float32),
        "wq": jax.random.normal(ks[0], (EMB, EMB), jnp.float32) * std,
        "wk": jax.random.normal(ks[1], (EMB, EMB), jnp.float32) * std,
        "wv": jax.random.normal(ks[2], (EMB, EMB), jnp.float32) * std,
        "wproj": jax.random.normal(ks[3], (EMB, EMB), jnp.float32) * std,
        "bproj": jnp.zeros((1, EMB), jnp.float32),
        "ln2_g": jnp.ones((1, EMB), jnp.float32),
        "ln2_b": jnp.zeros((1, EMB), jnp.float32),
        "w1": jax.random.normal(ks[4], (EMB, HIDDEN), jnp.float32) * std,
        "b1": jnp.zeros((1, HIDDEN), jnp.float32),
        "w2": jax.random.normal(ks[5], (HIDDEN, EMB), jnp.float32) * std,
        "b2": jnp.zeros((1, EMB), jnp.float32),
    }


if __name__ == "__main__":
    key = jax.random.PRNGKey(0)
    kx, kp = jax.random.split(key)
    x = jax.random.normal(kx, (BATCH, BLOCK_SIZE, EMB), jnp.float32)
    params = init_params(kp)

    out = decoder_block(x, params)
    jax.block_until_ready(out)
    assert out.shape == (BATCH, BLOCK_SIZE, EMB)
    assert bool(jnp.all(jnp.isfinite(out)))
    print("KERNEL_OK")
</pallas_src>

<mosaic_0001>
module attributes {stable_mosaic.version = 11 : i64} {
  func.func @block_kernel(%arg0: i32, %arg1: memref<16x32xf32, #tpu.memory_space<vmem>>, %arg2: memref<16x16xf32, #tpu.memory_space<vmem>>, %arg3: memref<1x32xf32, #tpu.memory_space<vmem>>, %arg4: memref<1x32xf32, #tpu.memory_space<vmem>>, %arg5: memref<32x96xbf16, #tpu.memory_space<vmem>>, %arg6: memref<32x32xbf16, #tpu.memory_space<vmem>>, %arg7: memref<1x32xf32, #tpu.memory_space<vmem>>, %arg8: memref<1x32xf32, #tpu.memory_space<vmem>>, %arg9: memref<1x32xf32, #tpu.memory_space<vmem>>, %arg10: memref<32x128xbf16, #tpu.memory_space<vmem>>, %arg11: memref<1x128xf32, #tpu.memory_space<vmem>>, %arg12: memref<128x32xbf16, #tpu.memory_space<vmem>>, %arg13: memref<1x32xf32, #tpu.memory_space<vmem>>, %arg14: memref<16x32xf32, #tpu.memory_space<vmem>>) attributes {dimension_semantics = [#tpu.dimension_semantics<arbitrary>], iteration_bounds = array<i64: 1>, scalar_prefetch = 0 : i64, scratch_operands = 0 : i64, tpu.core_type = #tpu.core_type<tc>, window_params = [{pipeline_mode = #tpu.pipeline_mode<synchronous>, transform_indices = @transform_0, window_bounds = array<i64: 16, 32>}, {pipeline_mode = #tpu.pipeline_mode<synchronous>, transform_indices = @transform_1, window_bounds = array<i64: 16, 16>}, {pipeline_mode = #tpu.pipeline_mode<synchronous>, transform_indices = @transform_2, window_bounds = array<i64: 1, 32>}, {pipeline_mode = #tpu.pipeline_mode<synchronous>, transform_indices = @transform_3, window_bounds = array<i64: 1, 32>}, {pipeline_mode = #tpu.pipeline_mode<synchronous>, transform_indices = @transform_4, window_bounds = array<i64: 32, 96>}, {pipeline_mode = #tpu.pipeline_mode<synchronous>, transform_indices = @transform_5, window_bounds = array<i64: 32, 32>}, {pipeline_mode = #tpu.pipeline_mode<synchronous>, transform_indices = @transform_6, window_bounds = array<i64: 1, 32>}, {pipeline_mode = #tpu.pipeline_mode<synchronous>, transform_indices = @transform_7, window_bounds = array<i64: 1, 32>}, {pipeline_mode = #tpu.pipeline_mode<synchronous>, transform_indices = @transform_8, window_bounds = array<i64: 1, 32>}, {pipeline_mode = #tpu.pipeline_mode<synchronous>, transform_indices = @transform_9, window_bounds = array<i64: 32, 128>}, {pipeline_mode = #tpu.pipeline_mode<synchronous>, transform_indices = @transform_10, window_bounds = array<i64: 1, 128>}, {pipeline_mode = #tpu.pipeline_mode<synchronous>, transform_indices = @transform_11, window_bounds = array<i64: 128, 32>}, {pipeline_mode = #tpu.pipeline_mode<synchronous>, transform_indices = @transform_12, window_bounds = array<i64: 1, 32>}, {pipeline_mode = #tpu.pipeline_mode<synchronous>, transform_indices = @transform_13, window_bounds = array<i64: 16, 32>}]} {
    %c0 = arith.constant 0 : index
    %c0_0 = arith.constant 0 : index
    %0 = vector.load %arg1[%c0, %c0_0] : memref<16x32xf32, #tpu.memory_space<vmem>>, vector<16x32xf32>
    %c0_1 = arith.constant 0 : index
    %c0_2 = arith.constant 0 : index
    %1 = vector.load %arg3[%c0_1, %c0_2] : memref<1x32xf32, #tpu.memory_space<vmem>>, vector<1x32xf32>
    %c0_3 = arith.constant 0 : index
    %c0_4 = arith.constant 0 : index
    %2 = vector.load %arg4[%c0_3, %c0_4] : memref<1x32xf32, #tpu.memory_space<vmem>>, vector<1x32xf32>
    %cst = arith.constant dense<0.000000e+00> : vector<16xf32>
    %3 = vector.multi_reduction <add>, %0, %cst [1] : vector<16x32xf32> to vector<16xf32>
    %4 = vector.shape_cast %3 : vector<16xf32> to vector<16x1xf32>
    %cst_5 = arith.constant 3.200000e+01 : f32
    %5 = vector.broadcast %cst_5 : f32 to vector<16x1xf32>
    %6 = arith.divf %4, %5 : vector<16x1xf32>
    %7 = vector.broadcast %6 : vector<16x1xf32> to vector<16x32xf32>
    %8 = arith.subf %0, %7 : vector<16x32xf32>
    %9 = arith.mulf %8, %8 : vector<16x32xf32>
    %cst_6 = arith.constant dense<0.000000e+00> : vector<16xf32>
    %10 = vector.multi_reduction <add>, %9, %cst_6 [1] : vector<16x32xf32> to vector<16xf32>
    %11 = vector.shape_cast %10 : vector<16xf32> to vector<16x1xf32>
    %cst_7 = arith.constant 3.200000e+01 : f32
    %12 = vector.broadcast %cst_7 : f32 to vector<16x1xf32>
    %13 = arith.divf %11, %12 : vector<16x1xf32>
    %14 = vector.broadcast %6 : vector<16x1xf32> to vector<16x32xf32>
    %15 = arith.subf %0, %14 : vector<16x32xf32>
    %cst_8 = arith.constant 9.99999974E-6 : f32
    %16 = vector.broadcast %cst_8 : f32 to vector<16x1xf32>
    %17 = arith.addf %13, %16 : vector<16x1xf32>
    %18 = math.rsqrt %17 : vector<16x1xf32>
    %19 = vector.broadcast %18 : vector<16x1xf32> to vector<16x32xf32>
    %20 = arith.mulf %15, %19 : vector<16x32xf32>
    %21 = vector.broadcast %1 : vector<1x32xf32> to vector<16x32xf32>
    %22 = arith.mulf %20, %21 : vector<16x32xf32>
    %23 = vector.broadcast %2 : vector<1x32xf32> to vector<16x32xf32>
    %24 = arith.addf %22, %23 : vector<16x32xf32>
    %25 = arith.truncf %24 : vector<16x32xf32> to vector<16x32xbf16>
    %c0_9 = arith.constant 0 : index
    %c0_10 = arith.constant 0 : index
    %26 = vector.load %arg5[%c0_9, %c0_10] : memref<32x96xbf16, #tpu.memory_space<vmem>>, vector<32x96xbf16>
    %cst_11 = arith.constant dense<0.000000e+00> : vector<16x96xf32>
    %27 = tpu.matmul %25, %26, %cst_11 {dimension_numbers = #tpu.dot_dimension_numbers<[1], [0], [0], [1], [0, 0, 1, 1], [], []>} : vector<16x32xbf16>, vector<32x96xbf16>, vector<16x96xf32> -> vector<16x96xf32>
    %28 = vector.extract_strided_slice %27 {offsets = [0, 0], sizes = [16, 32], strides = [1, 1]} : vector<16x96xf32> to vector<16x32xf32>
    %cst_12 = arith.constant 0.353553385 : f32
    %29 = vector.broadcast %cst_12 : f32 to vector<16x32xf32>
    %30 = arith.mulf %28, %29 : vector<16x32xf32>
    %31 = vector.extract_strided_slice %27 {offsets = [0, 32], sizes = [16, 32], strides = [1, 1]} : vector<16x96xf32> to vector<16x32xf32>
    %32 = vector.extract_strided_slice %27 {offsets = [0, 64], sizes = [16, 32], strides = [1, 1]} : vector<16x96xf32> to vector<16x32xf32>
    %c0_13 = arith.constant 0 : index
    %c0_14 = arith.constant 0 : index
    %33 = vector.load %arg2[%c0_13, %c0_14] : memref<16x16xf32, #tpu.memory_space<vmem>>, vector<16x16xf32>
    %c0_15 = arith.constant 0 : index
    %c0_16 = arith.constant 0 : index
    %34 = vector.load %arg6[%c0_15, %c0_16] : memref<32x32xbf16, #tpu.memory_space<vmem>>, vector<32x32xbf16>
    %cst_17 = arith.constant 0.000000e+00 : f32
    %35 = vector.broadcast %cst_17 : f32 to vector<16x32xf32>
    %36 = vector.extract_strided_slice %30 {offsets = [0, 0], sizes = [16, 8], strides = [1, 1]} : vector<16x32xf32> to vector<16x8xf32>
    %37 = arith.truncf %36 : vector<16x8xf32> to vector<16x8xbf16>
    %38 = vector.extract_strided_slice %31 {offsets = [0, 0], sizes = [16, 8], strides = [1, 1]} : vector<16x32xf32> to vector<16x8xf32>
    %39 = arith.truncf %38 : vector<16x8xf32> to vector<16x8xbf16>
    %40 = vector.extract_strided_slice %32 {offsets = [0, 0], sizes = [16, 8], strides = [1, 1]} : vector<16x32xf32> to vector<16x8xf32>
    %41 = arith.truncf %40 : vector<16x8xf32> to vector<16x8xbf16>
    %cst_18 = arith.constant dense<0.000000e+00> : vector<16x16xf32>
    %42 = tpu.matmul %37, %39, %cst_18 {dimension_numbers = #tpu.dot_dimension_numbers<[1], [1], [0], [0], [0, 0, 1, 0], [], []>} : vector<16x8xbf16>, vector<16x8xbf16>, vector<16x16xf32> -> vector<16x16xf32>
    %43 = arith.addf %42, %33 : vector<16x16xf32>
    %cst_19 = arith.constant dense<0xFF800000> : vector<16xf32>
    %44 = vector.multi_reduction <maximumf>, %43, %cst_19 [1] : vector<16x16xf32> to vector<16xf32>
    %45 = vector.shape_cast %44 : vector<16xf32> to vector<16x1xf32>
    %46 = vector.broadcast %45 : vector<16x1xf32> to vector<16x16xf32>
    %47 = arith.subf %43, %46 : vector<16x16xf32>
    %48 = math.exp %47 : vector<16x16xf32>
    %cst_20 = arith.constant dense<0.000000e+00> : vector<16xf32>
    %49 = vector.multi_reduction <add>, %48, %cst_20 [1] : vector<16x16xf32> to vector<16xf32>
    %50 = vector.shape_cast %49 : vector<16xf32> to vector<16x1xf32>
    %51 = tpu.reciprocal %50 {approx = true} : vector<16x1xf32> -> vector<16x1xf32>
    %52 = vector.broadcast %51 : vector<16x1xf32> to vector<16x16xf32>
    %53 = arith.mulf %48, %52 : vector<16x16xf32>
    %54 = arith.truncf %53 : vector<16x16xf32> to vector<16x16xbf16>
    %cst_21 = arith.constant dense<0.000000e+00> : vector<16x8xf32>
    %55 = tpu.matmul %54, %41, %cst_21 {dimension_numbers = #tpu.dot_dimension_numbers<[1], [0], [0], [1], [0, 0, 1, 1], [], []>} : vector<16x16xbf16>, vector<16x8xbf16>, vector<16x8xf32> -> vector<16x8xf32>
    %56 = arith.truncf %55 : vector<16x8xf32> to vector<16x8xbf16>
    %57 = vector.extract_strided_slice %34 {offsets = [0, 0], sizes = [8, 32], strides = [1, 1]} : vector<32x32xbf16> to vector<8x32xbf16>
    %cst_22 = arith.constant dense<0.000000e+00> : vector<16x32xf32>
    %58 = tpu.matmul %56, %57, %cst_22 {dimension_numbers = #tpu.dot_dimension_numbers<[1], [0], [0], [1], [0, 0, 1, 1], [], []>} : vector<16x8xbf16>, vector<8x32xbf16>, vector<16x32xf32> -> vector<16x32xf32>
    %59 = arith.addf %35, %58 : vector<16x32xf32>
    %60 = vector.extract_strided_slice %30 {offsets = [0, 8], sizes = [16, 8], strides = [1, 1]} : vector<16x32xf32> to vector<16x8xf32>
    %61 = arith.truncf %60 : vector<16x8xf32> to vector<16x8xbf16>
    %62 = vector.extract_strided_slice %31 {offsets = [0, 8], sizes = [16, 8], strides = [1, 1]} : vector<16x32xf32> to vector<16x8xf32>
    %63 = arith.truncf %62 : vector<16x8xf32> to vector<16x8xbf16>
    %64 = vector.extract_strided_slice %32 {offsets = [0, 8], sizes = [16, 8], strides = [1, 1]} : vector<16x32xf32> to vector<16x8xf32>
    %65 = arith.truncf %64 : vector<16x8xf32> to vector<16x8xbf16>
    %cst_23 = arith.constant dense<0.000000e+00> : vector<16x16xf32>
    %66 = tpu.matmul %61, %63, %cst_23 {dimension_numbers = #tpu.dot_dimension_numbers<[1], [1], [0], [0], [0, 0, 1, 0], [], []>} : vector<16x8xbf16>, vector<16x8xbf16>, vector<16x16xf32> -> vector<16x16xf32>
    %67 = arith.addf %66, %33 : vector<16x16xf32>
    %cst_24 = arith.constant dense<0xFF800000> : vector<16xf32>
    %68 = vector.multi_reduction <maximumf>, %67, %cst_24 [1] : vector<16x16xf32> to vector<16xf32>
    %69 = vector.shape_cast %68 : vector<16xf32> to vector<16x1xf32>
    %70 = vector.broadcast %69 : vector<16x1xf32> to vector<16x16xf32>
    %71 = arith.subf %67, %70 : vector<16x16xf32>
    %72 = math.exp %71 : vector<16x16xf32>
    %cst_25 = arith.constant dense<0.000000e+00> : vector<16xf32>
    %73 = vector.multi_reduction <add>, %72, %cst_25 [1] : vector<16x16xf32> to vector<16xf32>
    %74 = vector.shape_cast %73 : vector<16xf32> to vector<16x1xf32>
    %75 = tpu.reciprocal %74 {approx = true} : vector<16x1xf32> -> vector<16x1xf32>
    %76 = vector.broadcast %75 : vector<16x1xf32> to vector<16x16xf32>
    %77 = arith.mulf %72, %76 : vector<16x16xf32>
    %78 = arith.truncf %77 : vector<16x16xf32> to vector<16x16xbf16>
    %cst_26 = arith.constant dense<0.000000e+00> : vector<16x8xf32>
    %79 = tpu.matmul %78, %65, %cst_26 {dimension_numbers = #tpu.dot_dimension_numbers<[1], [0], [0], [1], [0, 0, 1, 1], [], []>} : vector<16x16xbf16>, vector<16x8xbf16>, vector<16x8xf32> -> vector<16x8xf32>
    %80 = arith.truncf %79 : vector<16x8xf32> to vector<16x8xbf16>
    %81 = vector.extract_strided_slice %34 {offsets = [8, 0], sizes = [8, 32], strides = [1, 1]} : vector<32x32xbf16> to vector<8x32xbf16>
    %cst_27 = arith.constant dense<0.000000e+00> : vector<16x32xf32>
    %82 = tpu.matmul %80, %81, %cst_27 {dimension_numbers = #tpu.dot_dimension_numbers<[1], [0], [0], [1], [0, 0, 1, 1], [], []>} : vector<16x8xbf16>, vector<8x32xbf16>, vector<16x32xf32> -> vector<16x32xf32>
    %83 = arith.addf %59, %82 : vector<16x32xf32>
    %84 = vector.extract_strided_slice %30 {offsets = [0, 16], sizes = [16, 8], strides = [1, 1]} : vector<16x32xf32> to vector<16x8xf32>
    %85 = arith.truncf %84 : vector<16x8xf32> to vector<16x8xbf16>
    %86 = vector.extract_strided_slice %31 {offsets = [0, 16], sizes = [16, 8], strides = [1, 1]} : vector<16x32xf32> to vector<16x8xf32>
    %87 = arith.truncf %86 : vector<16x8xf32> to vector<16x8xbf16>
    %88 = vector.extract_strided_slice %32 {offsets = [0, 16], sizes = [16, 8], strides = [1, 1]} : vector<16x32xf32> to vector<16x8xf32>
    %89 = arith.truncf %88 : vector<16x8xf32> to vector<16x8xbf16>
    %cst_28 = arith.constant dense<0.000000e+00> : vector<16x16xf32>
    %90 = tpu.matmul %85, %87, %cst_28 {dimension_numbers = #tpu.dot_dimension_numbers<[1], [1], [0], [0], [0, 0, 1, 0], [], []>} : vector<16x8xbf16>, vector<16x8xbf16>, vector<16x16xf32> -> vector<16x16xf32>
    %91 = arith.addf %90, %33 : vector<16x16xf32>
    %cst_29 = arith.constant dense<0xFF800000> : vector<16xf32>
    %92 = vector.multi_reduction <maximumf>, %91, %cst_29 [1] : vector<16x16xf32> to vector<16xf32>
    %93 = vector.shape_cast %92 : vector<16xf32> to vector<16x1xf32>
    %94 = vector.broadcast %93 : vector<16x1xf32> to vector<16x16xf32>
    %95 = arith.subf %91, %94 : vector<16x16xf32>
    %96 = math.exp %95 : vector<16x16xf32>
    %cst_30 = arith.constant dense<0.000000e+00> : vector<16xf32>
    %97 = vector.multi_reduction <add>, %96, %cst_30 [1] : vector<16x16xf32> to vector<16xf32>
    %98 = vector.shape_cast %97 : vector<16xf32> to vector<16x1xf32>
    %99 = tpu.reciprocal %98 {approx = true} : vector<16x1xf32> -> vector<16x1xf32>
    %100 = vector.broadcast %99 : vector<16x1xf32> to vector<16x16xf32>
    %101 = arith.mulf %96, %100 : vector<16x16xf32>
    %102 = arith.truncf %101 : vector<16x16xf32> to vector<16x16xbf16>
    %cst_31 = arith.constant dense<0.000000e+00> : vector<16x8xf32>
    %103 = tpu.matmul %102, %89, %cst_31 {dimension_numbers = #tpu.dot_dimension_numbers<[1], [0], [0], [1], [0, 0, 1, 1], [], []>} : vector<16x16xbf16>, vector<16x8xbf16>, vector<16x8xf32> -> vector<16x8xf32>
    %104 = arith.truncf %103 : vector<16x8xf32> to vector<16x8xbf16>
    %105 = vector.extract_strided_slice %34 {offsets = [16, 0], sizes = [8, 32], strides = [1, 1]} : vector<32x32xbf16> to vector<8x32xbf16>
    %cst_32 = arith.constant dense<0.000000e+00> : vector<16x32xf32>
    %106 = tpu.matmul %104, %105, %cst_32 {dimension_numbers = #tpu.dot_dimension_numbers<[1], [0], [0], [1], [0, 0, 1, 1], [], []>} : vector<16x8xbf16>, vector<8x32xbf16>, vector<16x32xf32> -> vector<16x32xf32>
    %107 = arith.addf %83, %106 : vector<16x32xf32>
    %108 = vector.extract_strided_slice %30 {offsets = [0, 24], sizes = [16, 8], strides = [1, 1]} : vector<16x32xf32> to vector<16x8xf32>
    %109 = arith.truncf %108 : vector<16x8xf32> to vector<16x8xbf16>
    %110 = vector.extract_strided_slice %31 {offsets = [0, 24], sizes = [16, 8], strides = [1, 1]} : vector<16x32xf32> to vector<16x8xf32>
    %111 = arith.truncf %110 : vector<16x8xf32> to vector<16x8xbf16>
    %112 = vector.extract_strided_slice %32 {offsets = [0, 24], sizes = [16, 8], strides = [1, 1]} : vector<16x32xf32> to vector<16x8xf32>
    %113 = arith.truncf %112 : vector<16x8xf32> to vector<16x8xbf16>
    %cst_33 = arith.constant dense<0.000000e+00> : vector<16x16xf32>
    %114 = tpu.matmul %109, %111, %cst_33 {dimension_numbers = #tpu.dot_dimension_numbers<[1], [1], [0], [0], [0, 0, 1, 0], [], []>} : vector<16x8xbf16>, vector<16x8xbf16>, vector<16x16xf32> -> vector<16x16xf32>
    %115 = arith.addf %114, %33 : vector<16x16xf32>
    %cst_34 = arith.constant dense<0xFF800000> : vector<16xf32>
    %116 = vector.multi_reduction <maximumf>, %115, %cst_34 [1] : vector<16x16xf32> to vector<16xf32>
    %117 = vector.shape_cast %116 : vector<16xf32> to vector<16x1xf32>
    %118 = vector.broadcast %117 : vector<16x1xf32> to vector<16x16xf32>
    %119 = arith.subf %115, %118 : vector<16x16xf32>
    %120 = math.exp %119 : vector<16x16xf32>
    %cst_35 = arith.constant dense<0.000000e+00> : vector<16xf32>
    %121 = vector.multi_reduction <add>, %120, %cst_35 [1] : vector<16x16xf32> to vector<16xf32>
    %122 = vector.shape_cast %121 : vector<16xf32> to vector<16x1xf32>
    %123 = tpu.reciprocal %122 {approx = true} : vector<16x1xf32> -> vector<16x1xf32>
    %124 = vector.broadcast %123 : vector<16x1xf32> to vector<16x16xf32>
    %125 = arith.mulf %120, %124 : vector<16x16xf32>
    %126 = arith.truncf %125 : vector<16x16xf32> to vector<16x16xbf16>
    %cst_36 = arith.constant dense<0.000000e+00> : vector<16x8xf32>
    %127 = tpu.matmul %126, %113, %cst_36 {dimension_numbers = #tpu.dot_dimension_numbers<[1], [0], [0], [1], [0, 0, 1, 1], [], []>} : vector<16x16xbf16>, vector<16x8xbf16>, vector<16x8xf32> -> vector<16x8xf32>
    %128 = arith.truncf %127 : vector<16x8xf32> to vector<16x8xbf16>
    %129 = vector.extract_strided_slice %34 {offsets = [24, 0], sizes = [8, 32], strides = [1, 1]} : vector<32x32xbf16> to vector<8x32xbf16>
    %cst_37 = arith.constant dense<0.000000e+00> : vector<16x32xf32>
    %130 = tpu.matmul %128, %129, %cst_37 {dimension_numbers = #tpu.dot_dimension_numbers<[1], [0], [0], [1], [0, 0, 1, 1], [], []>} : vector<16x8xbf16>, vector<8x32xbf16>, vector<16x32xf32> -> vector<16x32xf32>
    %131 = arith.addf %107, %130 : vector<16x32xf32>
    %c0_38 = arith.constant 0 : index
    %c0_39 = arith.constant 0 : index
    %132 = vector.load %arg7[%c0_38, %c0_39] : memref<1x32xf32, #tpu.memory_space<vmem>>, vector<1x32xf32>
    %133 = vector.broadcast %132 : vector<1x32xf32> to vector<16x32xf32>
    %134 = arith.addf %131, %133 : vector<16x32xf32>
    %135 = arith.addf %0, %134 : vector<16x32xf32>
    %c0_40 = arith.constant 0 : index
    %c0_41 = arith.constant 0 : index
    %136 = vector.load %arg8[%c0_40, %c0_41] : memref<1x32xf32, #tpu.memory_space<vmem>>, vector<1x32xf32>
    %c0_42 = arith.constant 0 : index
    %c0_43 = arith.constant 0 : index
    %137 = vector.load %arg9[%c0_42, %c0_43] : memref<1x32xf32, #tpu.memory_space<vmem>>, vector<1x32xf32>
    %cst_44 = arith.constant dense<0.000000e+00> : vector<16xf32>
    %138 = vector.multi_reduction <add>, %135, %cst_44 [1] : vector<16x32xf32> to vector<16xf32>
    %139 = vector.shape_cast %138 : vector<16xf32> to vector<16x1xf32>
    %cst_45 = arith.constant 3.200000e+01 : f32
    %140 = vector.broadcast %cst_45 : f32 to vector<16x1xf32>
    %141 = arith.divf %139, %140 : vector<16x1xf32>
    %142 = vector.broadcast %141 : vector<16x1xf32> to vector<16x32xf32>
    %143 = arith.subf %135, %142 : vector<16x32xf32>
    %144 = arith.mulf %143, %143 : vector<16x32xf32>
    %cst_46 = arith.constant dense<0.000000e+00> : vector<16xf32>
    %145 = vector.multi_reduction <add>, %144, %cst_46 [1] : vector<16x32xf32> to vector<16xf32>
    %146 = vector.shape_cast %145 : vector<16xf32> to vector<16x1xf32>
    %cst_47 = arith.constant 3.200000e+01 : f32
    %147 = vector.broadcast %cst_47 : f32 to vector<16x1xf32>
    %148 = arith.divf %146, %147 : vector<16x1xf32>
    %149 = vector.broadcast %141 : vector<16x1xf32> to vector<16x32xf32>
    %150 = arith.subf %135, %149 : vector<16x32xf32>
    %cst_48 = arith.constant 9.99999974E-6 : f32
    %151 = vector.broadcast %cst_48 : f32 to vector<16x1xf32>
    %152 = arith.addf %148, %151 : vector<16x1xf32>
    %153 = math.rsqrt %152 : vector<16x1xf32>
    %154 = vector.broadcast %153 : vector<16x1xf32> to vector<16x32xf32>
    %155 = arith.mulf %150, %154 : vector<16x32xf32>
    %156 = vector.broadcast %136 : vector<1x32xf32> to vector<16x32xf32>
    %157 = arith.mulf %155, %156 : vector<16x32xf32>
    %158 = vector.broadcast %137 : vector<1x32xf32> to vector<16x32xf32>
    %159 = arith.addf %157, %158 : vector<16x32xf32>
    %160 = arith.truncf %159 : vector<16x32xf32> to vector<16x32xbf16>
    %c0_49 = arith.constant 0 : index
    %c0_50 = arith.constant 0 : index
    %161 = vector.load %arg10[%c0_49, %c0_50] : memref<32x128xbf16, #tpu.memory_space<vmem>>, vector<32x128xbf16>
    %cst_51 = arith.constant dense<0.000000e+00> : vector<16x128xf32>
    %162 = tpu.matmul %160, %161, %cst_51 {dimension_numbers = #tpu.dot_dimension_numbers<[1], [0], [0], [1], [0, 0, 1, 1], [], []>} : vector<16x32xbf16>, vector<32x128xbf16>, vector<16x128xf32> -> vector<16x128xf32>
    %c0_52 = arith.constant 0 : index
    %c0_53 = arith.constant 0 : index
    %163 = vector.load %arg11[%c0_52, %c0_53] : memref<1x128xf32, #tpu.memory_space<vmem>>, vector<1x128xf32>
    %164 = vector.broadcast %163 : vector<1x128xf32> to vector<16x128xf32>
    %165 = arith.addf %162, %164 : vector<16x128xf32>
    %cst_54 = arith.constant 0.000000e+00 : f32
    %166 = vector.broadcast %cst_54 : f32 to vector<16x128xf32>
    %167 = arith.maximumf %165, %166 : vector<16x128xf32>
    %168 = arith.truncf %167 : vector<16x128xf32> to vector<16x128xbf16>
    %c0_55 = arith.constant 0 : index
    %c0_56 = arith.constant 0 : index
    %169 = vector.load %arg12[%c0_55, %c0_56] : memref<128x32xbf16, #tpu.memory_space<vmem>>, vector<128x32xbf16>
    %cst_57 = arith.constant dense<0.000000e+00> : vector<16x32xf32>
    %170 = tpu.matmul %168, %169, %cst_57 {dimension_numbers = #tpu.dot_dimension_numbers<[1], [0], [0], [1], [0, 0, 1, 1], [], []>} : vector<16x128xbf16>, vector<128x32xbf16>, vector<16x32xf32> -> vector<16x32xf32>
    %c0_58 = arith.constant 0 : index
    %c0_59 = arith.constant 0 : index
    %171 = vector.load %arg13[%c0_58, %c0_59] : memref<1x32xf32, #tpu.memory_space<vmem>>, vector<1x32xf32>
    %172 = vector.broadcast %171 : vector<1x32xf32> to vector<16x32xf32>
    %173 = arith.addf %170, %172 : vector<16x32xf32>
    %174 = arith.addf %135, %173 : vector<16x32xf32>
    %c0_60 = arith.constant 0 : index
    %c0_61 = arith.constant 0 : index
    %175 = vector.load %arg14[%c0_60, %c0_61] : memref<16x32xf32, #tpu.memory_space<vmem>>, vector<16x32xf32>
    tpu.vector_store %arg14[%c0_60, %c0_61], %174 {strides = array<i32>} : memref<16x32xf32, #tpu.memory_space<vmem>>, vector<16x32xf32>,
    return
  }
  func.func @transform_0(%arg0: i32) -> (i32, i32) {
    %c0_i32 = arith.constant 0 : i32
    %c0_i32_0 = arith.constant 0 : i32
    %c0_i32_1 = arith.constant 0 : i32
    return %c0_i32, %c0_i32_0 : i32, i32
  }
  func.func @transform_1(%arg0: i32) -> (i32, i32) {
    %c0_i32 = arith.constant 0 : i32
    %c0_i32_0 = arith.constant 0 : i32
    %c0_i32_1 = arith.constant 0 : i32
    return %c0_i32, %c0_i32_0 : i32, i32
  }
  func.func @transform_2(%arg0: i32) -> (i32, i32) {
    %c0_i32 = arith.constant 0 : i32
    %c0_i32_0 = arith.constant 0 : i32
    %c0_i32_1 = arith.constant 0 : i32
    return %c0_i32, %c0_i32_0 : i32, i32
  }
  func.func @transform_3(%arg0: i32) -> (i32, i32) {
    %c0_i32 = arith.constant 0 : i32
    %c0_i32_0 = arith.constant 0 : i32
    %c0_i32_1 = arith.constant 0 : i32
    return %c0_i32, %c0_i32_0 : i32, i32
  }
  func.func @transform_4(%arg0: i32) -> (i32, i32) {
    %c0_i32 = arith.constant 0 : i32
    %c0_i32_0 = arith.constant 0 : i32
    %c0_i32_1 = arith.constant 0 : i32
    return %c0_i32, %c0_i32_0 : i32, i32
  }
  func.func @transform_5(%arg0: i32) -> (i32, i32) {
    %c0_i32 = arith.constant 0 : i32
    %c0_i32_0 = arith.constant 0 : i32
    %c0_i32_1 = arith.constant 0 : i32
    return %c0_i32, %c0_i32_0 : i32, i32
  }
  func.func @transform_6(%arg0: i32) -> (i32, i32) {
    %c0_i32 = arith.constant 0 : i32
    %c0_i32_0 = arith.constant 0 : i32
    %c0_i32_1 = arith.constant 0 : i32
    return %c0_i32, %c0_i32_0 : i32, i32
  }
  func.func @transform_7(%arg0: i32) -> (i32, i32) {
    %c0_i32 = arith.constant 0 : i32
    %c0_i32_0 = arith.constant 0 : i32
    %c0_i32_1 = arith.constant 0 : i32
    return %c0_i32, %c0_i32_0 : i32, i32
  }
  func.func @transform_8(%arg0: i32) -> (i32, i32) {
    %c0_i32 = arith.constant 0 : i32
    %c0_i32_0 = arith.constant 0 : i32
    %c0_i32_1 = arith.constant 0 : i32
    return %c0_i32, %c0_i32_0 : i32, i32
  }
  func.func @transform_9(%arg0: i32) -> (i32, i32) {
    %c0_i32 = arith.constant 0 : i32
    %c0_i32_0 = arith.constant 0 : i32
    %c0_i32_1 = arith.constant 0 : i32
    return %c0_i32, %c0_i32_0 : i32, i32
  }
  func.func @transform_10(%arg0: i32) -> (i32, i32) {
    %c0_i32 = arith.constant 0 : i32
    %c0_i32_0 = arith.constant 0 : i32
    %c0_i32_1 = arith.constant 0 : i32
    return %c0_i32, %c0_i32_0 : i32, i32
  }
  func.func @transform_11(%arg0: i32) -> (i32, i32) {
    %c0_i32 = arith.constant 0 : i32
    %c0_i32_0 = arith.constant 0 : i32
    %c0_i32_1 = arith.constant 0 : i32
    return %c0_i32, %c0_i32_0 : i32, i32
  }
  func.func @transform_12(%arg0: i32) -> (i32, i32) {
    %c0_i32 = arith.constant 0 : i32
    %c0_i32_0 = arith.constant 0 : i32
    %c0_i32_1 = arith.constant 0 : i32
    return %c0_i32, %c0_i32_0 : i32, i32
  }
  func.func @transform_13(%arg0: i32) -> (i32, i32) {
    %c0_i32 = arith.constant 0 : i32
    %c0_i32_0 = arith.constant 0 : i32
    %c0_i32_1 = arith.constant 0 : i32
    return %c0_i32, %c0_i32_0 : i32, i32
  }
}

</mosaic_0001>

<bundles_post_ra>
// kernel: decoder_block.1
= control target key start
LH: loop header
LB: loop body
LE: loop exit
PB: predicated region body
PF: predicated region fallthrough
CT: control target
= control target key end

     0   :  { %vm50_vm0 = vcmask 261120   ;;  %s1708_s0 = inlined_call_operand.vmem [shape: f32[16,32], index: 0, kind: input, shape index: {}]   ;;  %s1709_s1 = inlined_call_operand.vmem [shape: f32[16,16], index: 1, kind: input, shape index: {}]   ;;  %s1710_s2 = inlined_call_operand.vmem [shape: f32[1,32], index: 2, kind: input, shape index: {}]   ;;  %s1711_s3 = inlined_call_operand.vmem [shape: f32[1,32], index: 3, kind: input, shape index: {}]   ;;  %s1712_s4 = inlined_call_operand.vmem [shape: bf16[32,96], index: 4, kind: input, shape index: {}]   ;;  %s1713_s5 = inlined_call_operand.vmem [shape: bf16[32,32], index: 5, kind: input, shape index: {}]   ;;  %s1714_s6 = inlined_call_operand.vmem [shape: f32[1,32], index: 6, kind: input, shape index: {}]   ;;  %s1715_s7 = inlined_call_operand.vmem [shape: f32[1,32], index: 7, kind: input, shape index: {}]   ;;  %s1716_s8 = inlined_call_operand.vmem [shape: f32[1,32], index: 8, kind: input, shape index: {}]   ;;  %s1717_s9 = inlined_call_operand.vmem [shape: bf16[32,128], index: 9, kind: input, shape index: {}]   ;;  %s1718_s10 = inlined_call_operand.vmem [shape: f32[1,128], index: 10, kind: input, shape index: {}]   ;;  %s1719_s11 = inlined_call_operand.vmem [shape: bf16[128,32], index: 11, kind: input, shape index: {}]   ;;  %s1720_s12 = inlined_call_operand.vmem [shape: f32[1,32], index: 12, kind: input, shape index: {}]   ;;  %s1721_s13 = inlined_call_operand.hbm [shape: f32[16,32], index: 13, kind: output, shape index: {}]  }
   0x1   :  { %v1465_v0 = vld [vmem:[%s1708_s0] sm:$0xff]  ;;  %v1470_v1 = vld [vmem:[%s1708_s0 + $0x8] sm:$0xff] }
   0x2   :  { %v51_v2 = vsel %vm50_vm0, %v1465_v0, 0.0  ;;  %v54_v3 = vsel %vm50_vm0, %v1470_v1, 0.0 }
   0x3   :  { %52 = vadd.xlane.f32.xlu0 %v51_v2 }
   0x7   :  { %55 = vadd.xlane.f32.xlu0 %v54_v3 }
   0x8   :  { %18 = vsyncpa [#allocation3], 0  ;;  %v1302_v14 = vld [vmem:[%s1712_s4 + $0x8] sm:$0xff]   ;;  %v1376_v15 = vmov 0.0   ;;  %vm1377_vm1 = vmmov 0   ;;  %v1303_v16 = vld [vmem:[%s1712_s4] sm:$0xff]  }
   0x9   :  { %1178 = vmatprep.subr.bf16.mxu1 %v1376_v15  ;;  %1182 = vmatprep.mubr.msk.bf16.mxu1 %vm1377_vm1, %v1376_v15  ;;  %v1106_v25 = vld [vmem:[%s1710_s2] ss:$0 sm:$0xff]  ;;  %s1378_s2 = smov 96   ;;  %s1380_s18 = smov 120   ;;  %vm168_vm2 = vcmask 64512   ;;  %vm216_vm3 = vcmask 130048  }
   0xa   :  { %1179 = vmatpush3.bf16.msra.mxu1 %v1302_v14  ;;  %1204 = vmatprep.subr.bf16.mxu0 %v1376_v15  ;;  %v1107_v29 = vld [vmem:[%s1711_s3] ss:$0 sm:$0xff]  ;;  %s1379_s3 = smov 88   ;;  %v1525_v48 = vld [vmem:[%s1709_s1 + $0x8] sm:$0xff]  ;;  %s1382_s23 = smov 80   ;;  %vm414_vm4 = vcmask 1043456  }
   0xb   :  { %1180 = vmatprep.subr.bf16.mxu1 %v1376_v15  ;;  %1206 = vmatprep.mubr.msk.bf16.mxu0 %vm1377_vm1, %v1376_v15  ;;  %v1519_v44 = vld [vmem:[%s1709_s1] sm:$0xff]  ;;  %s1381_s1 = smov 64   ;;  %s1383_s24 = smov 112  }
   0xc   :  { %s1384_s25 = smov 56   ;;  %s1385_s29 = smov 48  }
   0xd   :  { %s1386_s30 = smov 104   ;;  %s1387_s14 = smov 72  }
   0xe   :  { %1181 = vmatpush3.bf16.msra.mxu1 %v1303_v16  ;;  %s1388_s16 = smov 40  }
   0xf   :  { %1186 = vmatprep.subr.bf16.mxu1 %v1376_v15 }
  0x8c   :  { %v53_v4 = vpop.xlane.xlu0 %52 }
  0x8d   :  { %v58_v5 = vmul.f32 0.03125, %v53_v4 }
  0x8f   :  { %v60_v6 = vsub.f32 %v1465_v0, %v58_v5 }
  0x90   :  { %v56_v7 = vpop.xlane.xlu0 %55 }
  0x91   :  { %v59_v8 = vmul.f32 0.03125, %v56_v7  ;;  %v62_v9 = vmul.f32 %v60_v6, %v60_v6 }
  0x93   :  { %v61_v10 = vsub.f32 %v1470_v1, %v59_v8  ;;  %v64_v11 = vsel %vm50_vm0, %v62_v9, 0.0 }
  0x94   :  { %65 = vadd.xlane.f32.xlu1 %v64_v11 }
  0x95   :  { %v63_v12 = vmul.f32 %v61_v10, %v61_v10 }
  0x97   :  { %v67_v13 = vsel %vm50_vm0, %v63_v12, 0.0 }
  0x98   :  { %68 = vadd.xlane.f32.xlu1 %v67_v13 }
 0x11d   :  { %v66_v17 = vpop.xlane.xlu1 %65 }
 0x11e   :  { %v70_v18 = vmul.f32 0.03125, %v66_v17 }
 0x120   :  { %v72_v19 = vadd.f32 1e-05, %v70_v18 }
 0x121   :  { %v69_v20 = vpop.xlane.xlu1 %68 }
 0x122   :  { %1314 = vrsqrt.f32 %v72_v19  ;;  %v71_v21 = vmul.f32 0.03125, %v69_v20 }
 0x124   :  { %v73_v22 = vadd.f32 1e-05, %v71_v21 }
 0x126   :  { %1316 = vrsqrt.f32 %v73_v22 }
 0x12f   :  { %v1315_v23 = vpop.eup %1314 }
 0x130   :  { %v76_v24 = vmul.f32 %v1315_v23, %v60_v6 }
 0x132   :  { %v84_v28 = vmul.f32 %v1106_v25, %v76_v24 }
 0x133   :  { %v1317_v26 = vpop.eup %1316 }
 0x134   :  { %v77_v27 = vmul.f32 %v1317_v26, %v61_v10  ;;  %v92_v31 = vadd.f32 %v1107_v29, %v84_v28 }
 0x136   :  { %v85_v30 = vmul.f32 %v1106_v25, %v77_v27 }
 0x138   :  { %v93_v32 = vadd.f32 %v1107_v29, %v85_v30 }
 0x13a   :  { %v94_v33 = vpack.c.bf16 %v93_v32, %v92_v31 }
 0x13c   :  { %1183 = vmatmul.mubr.msk.bf16.vlgmr.msra.gmra.mxu1 %vm50_vm0, %v94_v33 }
 0x13d   :  { %1188 = vmatprep.mubr.msk.bf16.mxu1 %vm1377_vm1, %v1376_v15 }
 0x1fc   :  { %v148_v34 = vpop.f32.mrf.mxu1 }
 0x1fd   :  { %v155_v40 = vmul.f32 0.35355338, %v148_v34 }
 0x1fe   :  { %v1184_v35 = vpop.f32.mrf.mxu1 }
 0x200   :  { %v151_v36 = vpop.f32.mrf.mxu1 }
 0x201   :  { %v1503_v37 = vpack.c.bf16 %v151_v36, %v148_v34  ;;  %v156_v39 = vmul.f32 0.35355338, %v151_v36 }
 0x202   :  { %v1185_v38 = vpop.f32.mrf.mxu1 }
 0x203   :  { %166 = vrot.lane.b32.xlu0 %v1503_v37, %s1378_s2  ;;  %v1507_v41 = vpack.c.bf16 %v156_v39, %v155_v40 }
 0x207   :  { %291 = vrot.lane.b32.xlu0 %v1503_v37, %s1379_s3 }
 0x20b   :  { %289 = vrot.lane.b32.xlu0 %v1507_v41, %s1380_s18 }
 0x275   :  { %v167_v42 = vpop.permute.xlu0 %166 }
 0x276   :  { %v173_v43 = vsel %vm168_vm2, %v167_v42, 0 }
 0x277   :  { %1187 = vmatpush3.bf16.xpose.msra.mxu1 %v173_v43 }
 0x278   :  { %1192 = vmatprep.subr.bf16.mxu1 %v1376_v15 }
 0x279   :  { %v292_v9 = vpop.permute.xlu0 %291 }
 0x27a   :  { %v297_v11 = vsel %vm168_vm2, %v292_v9, 0 }
 0x27d   :  { %v290_v12 = vpop.permute.xlu0 %289 }
 0x27e   :  { %1189 = vmatmul.mubr.msk.bf16.vlgmr.msra.gmra.mxu1 %vm168_vm2, %v1507_v41 }
 0x27f   :  { %1194 = vmatprep.mubr.msk.bf16.mxu1 %vm1377_vm1, %v1376_v15 }
 0x33e   :  { %v209_v45 = vpop.f32.mrf.mxu1 }
 0x33f   :  { %v210_v46 = vadd.f32 %v209_v45, %v1519_v44  ;;  %v159_v45 = vld [vmem:[%s1713_s5] sm:$0xf] }
 0x340   :  { %v1190_v47 = vpop.f32.mrf.mxu1 }
 0x341   :  { %v217_v49 = vsel %vm216_vm3, %v210_v46, -inf }
 0x342   :  { %218 = vmax.xlane.f32.xlu1 %v217_v49  ;;  %v212_v50 = vpop.f32.mrf.mxu1 }
 0x343   :  { %v213_v51 = vadd.f32 %v212_v50, %v1525_v48  ;;  %v463_v50 = vsel %vm414_vm4, %v159_v45, 0 }
 0x344   :  { %v1191_v52 = vpop.f32.mrf.mxu1 }
 0x345   :  { %v220_v53 = vsel %vm216_vm3, %v213_v51, -inf }
 0x346   :  { %221 = vmax.xlane.f32.xlu1 %v220_v53 }
 0x3cb   :  { %v219_v54 = vpop.xlane.xlu1 %218 }
 0x3cc   :  { %v223_v55 = vsub.f32 %v210_v46, %v219_v54 }
 0x3ce   :  { %v225_v56 = vmul.f32 1.442695, %v223_v55 }
 0x3cf   :  { %v222_v57 = vpop.xlane.xlu1 %221 }
 0x3d0   :  { %1318 = vpow2.f32 %v225_v56  ;;  %v224_v58 = vsub.f32 %v213_v51, %v222_v57  ;;  %v160_v51 = vld [vmem:[%s1713_s5 + $0x4] sm:$0xf] }
 0x3d1   :  { %v416_v52 = vsel %vm414_vm4, %v160_v51, 0 }
 0x3d2   :  { %v227_v59 = vmul.f32 1.442695, %v224_v58 }
 0x3d4   :  { %1320 = vpow2.f32 %v227_v59 }
 0x3dd   :  { %v1319_v60 = vpop.eup %1318 }
 0x3de   :  { %v229_v61 = vsel %vm216_vm3, %v1319_v60, 0.0 }
 0x3df   :  { %230 = vadd.xlane.f32.xlu1 %v229_v61 }
 0x3e1   :  { %v1321_v62 = vpop.eup %1320 }
 0x3e2   :  { %v232_v63 = vsel %vm216_vm3, %v1321_v62, 0.0 }
 0x3e3   :  { %233 = vadd.xlane.f32.xlu1 %v232_v63 }
 0x3f4   :  { %240 = vrot.lane.b32.xlu1 %v1503_v37, %s1381_s1 }
 0x468   :  { %v231_v2 = vpop.xlane.xlu1 %230 }
 0x469   :  { %1322 = vrcp.f32 %v231_v2 }
 0x46c   :  { %v234_v3 = vpop.xlane.xlu1 %233 }
 0x46d   :  { %1324 = vrcp.f32 %v234_v3 }
 0x470   :  { %v241_v4 = vpop.permute.xlu1 %240 }
 0x471   :  { %1193 = vmatpush3.bf16.msra.mxu1 %v241_v4 }
 0x472   :  { %1198 = vmatprep.subr.bf16.mxu1 %v1376_v15 }
 0x476   :  { %v1323_v5 = vpop.eup %1322 }
 0x477   :  { %v237_v7 = vmul.f32 %v1323_v5, %v1319_v60 }
 0x47a   :  { %v1325_v6 = vpop.eup %1324 }
 0x47b   :  { %v238_v8 = vmul.f32 %v1325_v6, %v1321_v62 }
 0x47d   :  { %v239_v10 = vpack.c.bf16 %v238_v8, %v237_v7 }
 0x47f   :  { %1195 = vmatmul.mubr.msk.bf16.vlgmr.msra.gmra.mxu1 %vm216_vm3, %v239_v10 }
 0x480   :  { %1199 = vmatpush3.bf16.xpose.msra.mxu1 %v297_v11  ;;  %1200 = vmatprep.mubr.msk.bf16.mxu1 %vm1377_vm1, %v1376_v15 }
 0x481   :  { %1210 = vmatprep.subr.bf16.mxu1 %v1376_v15 }
 0x487   :  { %1201 = vmatmul.mubr.msk.bf16.vlgmr.msra.gmra.mxu1 %vm168_vm2, %v290_v12 }
 0x488   :  { %1212 = vmatprep.mubr.msk.bf16.mxu1 %vm1377_vm1, %v1376_v15  ;;  %1211 = vmatpush3.bf16.msra.mxu1 %v416_v52 }
 0x489   :  { %1222 = vmatprep.subr.bf16.mxu1 %v1376_v15 }
 0x53f   :  { %v280_v13 = vpop.f32.mrf.mxu1 }
 0x541   :  { %v1196_v14 = vpop.f32.mrf.mxu1 }
 0x543   :  { %v283_v16 = vpop.f32.mrf.mxu1 }
 0x544   :  { %v287_v17 = vpack.c.bf16 %v283_v16, %v280_v13 }
 0x545   :  { %v1197_v18 = vpop.f32.mrf.mxu1 }
 0x547   :  { %v333_v19 = vpop.f32.mrf.mxu1 }
 0x548   :  { %v334_v20 = vadd.f32 %v333_v19, %v1519_v44 }
 0x549   :  { %v1202_v21 = vpop.f32.mrf.mxu1 }
 0x54a   :  { %v340_v22 = vsel %vm216_vm3, %v334_v20, -inf }
 0x54b   :  { %341 = vmax.xlane.f32.xlu0 %v340_v22  ;;  %v336_v23 = vpop.f32.mrf.mxu1 }
 0x54c   :  { %v337_v24 = vadd.f32 %v336_v23, %v1525_v48 }
 0x54d   :  { %v1203_v25 = vpop.f32.mrf.mxu1 }
 0x54e   :  { %v343_v26 = vsel %vm216_vm3, %v337_v24, -inf }
 0x54f   :  { %344 = vmax.xlane.f32.xlu1 %v343_v26 }
 0x560   :  { %508 = vrot.lane.b32.xlu1 %v1503_v37, %s1382_s23 }
 0x564   :  { %506 = vrot.lane.b32.xlu1 %v1507_v41, %s1383_s24 }
 0x5d4   :  { %v342_v27 = vpop.xlane.xlu0 %341 }
 0x5d5   :  { %v346_v28 = vsub.f32 %v334_v20, %v342_v27 }
 0x5d7   :  { %v348_v29 = vmul.f32 1.442695, %v346_v28 }
 0x5d8   :  { %v345_v30 = vpop.xlane.xlu1 %344 }
 0x5d9   :  { %1326 = vpow2.f32 %v348_v29  ;;  %v347_v31 = vsub.f32 %v337_v24, %v345_v30 }
 0x5db   :  { %v350_v32 = vmul.f32 1.442695, %v347_v31 }
 0x5dc   :  { %v509_v55 = vpop.permute.xlu1 %508 }
 0x5dd   :  { %1328 = vpow2.f32 %v350_v32  ;;  %v514_v59 = vsel %vm168_vm2, %v509_v55, 0 }
 0x5e0   :  { %v507_v63 = vpop.permute.xlu1 %506 }
 0x5e6   :  { %v1327_v33 = vpop.eup %1326 }
 0x5e7   :  { %v352_v34 = vsel %vm216_vm3, %v1327_v33, 0.0 }
 0x5e8   :  { %353 = vadd.xlane.f32.xlu0 %v352_v34 }
 0x5ea   :  { %v1329_v35 = vpop.eup %1328 }
 0x5eb   :  { %v355_v36 = vsel %vm216_vm3, %v1329_v35, 0.0 }
 0x5ec   :  { %356 = vadd.xlane.f32.xlu0 %v355_v36  ;;  %v161_v36 = vld [vmem:[%s1713_s5 + $0x8] sm:$0xf] }
 0x602   :  { %363 = vrot.lane.b32.xlu0 %v1503_v37, %s1384_s25 }
 0x671   :  { %v354_v38 = vpop.xlane.xlu0 %353 }
 0x672   :  { %1330 = vrcp.f32 %v354_v38  ;;  %v632_v38 = vsel %vm414_vm4, %v161_v36, 0 }
 0x675   :  { %v357_v39 = vpop.xlane.xlu0 %356 }
 0x676   :  { %1332 = vrcp.f32 %v357_v39 }
 0x679   :  { %v364_v40 = vpop.permute.xlu0 %363 }
 0x67a   :  { %1205 = vmatpush3.bf16.msra.mxu0 %v364_v40 }
 0x67b   :  { %1216 = vmatprep.subr.bf16.mxu0 %v1376_v15 }
 0x67f   :  { %v1331_v42 = vpop.eup %1330 }
 0x680   :  { %v360_v46 = vmul.f32 %v1331_v42, %v1327_v33 }
 0x683   :  { %v1333_v43 = vpop.eup %1332 }
 0x684   :  { %v361_v47 = vmul.f32 %v1333_v43, %v1329_v35 }
 0x686   :  { %v362_v49 = vpack.c.bf16 %v361_v47, %v360_v46 }
 0x688   :  { %1207 = vmatmul.mubr.msk.bf16.vlgmr.msra.gmra.mxu0 %vm216_vm3, %v362_v49 }
 0x689   :  { %1217 = vmatpush3.bf16.msra.mxu0 %v463_v50  ;;  %1218 = vmatprep.mubr.msk.bf16.mxu0 %vm1377_vm1, %v1376_v15 }
 0x68a   :  { %1228 = vmatprep.subr.bf16.mxu0 %v1376_v15 }
 0x690   :  { %1219 = vmatmul.mubr.msk.bf16.vlgmr.msra.gmra.mxu0 %vm168_vm2, %v287_v17 }
 0x691   :  { %1230 = vmatprep.mubr.msk.bf16.mxu0 %vm1377_vm1, %v1376_v15 }
 0x748   :  { %v403_v53 = vpop.f32.mrf.mxu0 }
 0x74a   :  { %v1208_v54 = vpop.f32.mrf.mxu0 }
 0x74c   :  { %v406_v56 = vpop.f32.mrf.mxu0 }
 0x74d   :  { %v410_v57 = vpack.c.bf16 %v406_v56, %v403_v53 }
 0x74e   :  { %v1209_v58 = vpop.f32.mrf.mxu0 }
 0x74f   :  { %1213 = vmatmul.mubr.msk.bf16.vlgmr.msra.gmra.mxu1 %vm168_vm2, %v410_v57 }
 0x750   :  { %1223 = vmatpush3.bf16.xpose.msra.mxu1 %v514_v59  ;;  %v1570_v60 = vpop.f32.mrf.mxu0  ;;  %1224 = vmatprep.mubr.msk.bf16.mxu1 %vm1377_vm1, %v1376_v15 }
 0x751   :  { %1234 = vmatprep.subr.bf16.mxu1 %v1376_v15 }
 0x752   :  { %v1220_v61 = vpop.f32.mrf.mxu0 }
 0x754   :  { %v1575_v62 = vpop.f32.mrf.mxu0 }
 0x756   :  { %v1221_v2 = vpop.f32.mrf.mxu0 }
 0x757   :  { %1225 = vmatmul.mubr.msk.bf16.vlgmr.msra.gmra.mxu1 %vm168_vm2, %v507_v63 }
 0x758   :  { %1236 = vmatprep.mubr.msk.bf16.mxu1 %vm1377_vm1, %v1376_v15  ;;  %1235 = vmatpush3.bf16.msra.mxu1 %v632_v38 }
 0x759   :  { %1246 = vmatprep.subr.bf16.mxu1 %v1376_v15 }
 0x80f   :  { %v1580_v3 = vpop.f32.mrf.mxu1 }
 0x811   :  { %v1214_v4 = vpop.f32.mrf.mxu1 }
 0x813   :  { %v1582_v5 = vpop.f32.mrf.mxu1 }
 0x815   :  { %v1215_v6 = vpop.f32.mrf.mxu1 }
 0x817   :  { %v550_v7 = vpop.f32.mrf.mxu1 }
 0x818   :  { %v551_v8 = vadd.f32 %v550_v7, %v1519_v44 }
 0x819   :  { %v1226_v9 = vpop.f32.mrf.mxu1 }
 0x81a   :  { %v557_v10 = vsel %vm216_vm3, %v551_v8, -inf  ;;  %v503_v9 = vadd.f32 %v1575_v62, %v1582_v5  ;;  %v162_v62 = vld [vmem:[%s1713_s5 + $0xc] sm:$0xf] }
 0x81b   :  { %558 = vmax.xlane.f32.xlu1 %v557_v10  ;;  %v553_v11 = vpop.f32.mrf.mxu1  ;;  %v803_v5 = vsel %vm414_vm4, %v162_v62, 0 }
 0x81c   :  { %v554_v12 = vadd.f32 %v553_v11, %v1525_v48 }
 0x81d   :  { %v1227_v13 = vpop.f32.mrf.mxu1 }
 0x81e   :  { %v560_v14 = vsel %vm216_vm3, %v554_v12, -inf }
 0x81f   :  { %561 = vmax.xlane.f32.xlu0 %v560_v14 }
 0x82c   :  { %580 = vrot.lane.b32.xlu1 %v1503_v37, %s1385_s29 }
 0x830   :  { %677 = vrot.lane.b32.xlu1 %v1507_v41, %s1386_s30 }
 0x8a4   :  { %v559_v16 = vpop.xlane.xlu1 %558 }
 0x8a5   :  { %v563_v17 = vsub.f32 %v551_v8, %v559_v16 }
 0x8a7   :  { %v565_v18 = vmul.f32 1.442695, %v563_v17 }
 0x8a8   :  { %v581_v19 = vpop.permute.xlu1 %580  ;;  %v562_v20 = vpop.xlane.xlu0 %561 }
 0x8a9   :  { %1334 = vpow2.f32 %v565_v18  ;;  %v564_v21 = vsub.f32 %v554_v12, %v562_v20  ;;  %1229 = vmatpush3.bf16.msra.mxu0 %v581_v19 }
 0x8aa   :  { %1240 = vmatprep.subr.bf16.mxu0 %v1376_v15 }
 0x8ab   :  { %v567_v22 = vmul.f32 1.442695, %v564_v21 }
 0x8ac   :  { %v678_v35 = vpop.permute.xlu1 %677 }
 0x8ad   :  { %1336 = vpow2.f32 %v567_v22 }
 0x8b6   :  { %v1335_v23 = vpop.eup %1334 }
 0x8b7   :  { %v569_v24 = vsel %vm216_vm3, %v1335_v23, 0.0 }
 0x8b8   :  { %570 = vadd.xlane.f32.xlu0 %v569_v24 }
 0x8ba   :  { %v1337_v25 = vpop.eup %1336 }
 0x8bb   :  { %v572_v26 = vsel %vm216_vm3, %v1337_v25, 0.0 }
 0x8bc   :  { %573 = vadd.xlane.f32.xlu0 %v572_v26 }
 0x8d2   :  { %679 = vrot.lane.b32.xlu0 %v1503_v37, %s1387_s14 }
 0x941   :  { %v571_v41 = vpop.xlane.xlu0 %570 }
 0x942   :  { %1338 = vrcp.f32 %v571_v41 }
 0x945   :  { %v574_v27 = vpop.xlane.xlu0 %573 }
 0x946   :  { %1340 = vrcp.f32 %v574_v27 }
 0x949   :  { %v680_v32 = vpop.permute.xlu0 %679 }
 0x94a   :  { %v685_v34 = vsel %vm168_vm2, %v680_v32, 0 }
 0x94f   :  { %v1339_v28 = vpop.eup %1338 }
 0x950   :  { %v577_v30 = vmul.f32 %v1339_v28, %v1335_v23 }
 0x953   :  { %v1341_v29 = vpop.eup %1340 }
 0x954   :  { %v578_v31 = vmul.f32 %v1341_v29, %v1337_v25  ;;  %v1123_v25 = vld [vmem:[%s1714_s6] ss:$0 sm:$0xff] }
 0x956   :  { %v579_v33 = vpack.c.bf16 %v578_v31, %v577_v30 }
 0x958   :  { %1231 = vmatmul.mubr.msk.bf16.vlgmr.msra.gmra.mxu0 %vm216_vm3, %v579_v33 }
 0x959   :  { %1241 = vmatpush3.bf16.xpose.msra.mxu0 %v685_v34  ;;  %1242 = vmatprep.mubr.msk.bf16.mxu0 %vm1377_vm1, %v1376_v15 }
 0x95a   :  { %1252 = vmatprep.subr.bf16.mxu0 %v1376_v15 }
 0x960   :  { %1243 = vmatmul.mubr.msk.bf16.vlgmr.msra.gmra.mxu0 %vm168_vm2, %v678_v35 }
 0x961   :  { %1254 = vmatprep.mubr.msk.bf16.mxu0 %vm1377_vm1, %v1376_v15  ;;  %1253 = vmatpush3.bf16.msra.mxu0 %v803_v5 }
 0x962   :  { %1266 = vmatprep.subr.bf16.mxu0 %v1376_v15 }
 0xa18   :  { %v620_v39 = vpop.f32.mrf.mxu0 }
 0xa1a   :  { %v1232_v40 = vpop.f32.mrf.mxu0 }
 0xa1c   :  { %v623_v42 = vpop.f32.mrf.mxu0 }
 0xa1d   :  { %v627_v43 = vpack.c.bf16 %v623_v42, %v620_v39 }
 0xa1e   :  { %v1233_v45 = vpop.f32.mrf.mxu0 }
 0xa1f   :  { %1237 = vmatmul.mubr.msk.bf16.vlgmr.msra.gmra.mxu1 %vm168_vm2, %v627_v43 }
 0xa20   :  { %v721_v46 = vpop.f32.mrf.mxu0  ;;  %1248 = vmatprep.mubr.msk.bf16.mxu1 %vm1377_vm1, %v1376_v15 }
 0xa21   :  { %v722_v47 = vadd.f32 %v721_v46, %v1519_v44 }
 0xa22   :  { %v1244_v49 = vpop.f32.mrf.mxu0 }
 0xa23   :  { %v728_v50 = vsel %vm216_vm3, %v722_v47, -inf  ;;  %v1305_v49 = vld [vmem:[%s1717_s9] sm:$0xff]  }
 0xa24   :  { %729 = vmax.xlane.f32.xlu1 %v728_v50  ;;  %v724_v51 = vpop.f32.mrf.mxu0  ;;  %v1306_v50 = vld [vmem:[%s1719_s11 + $0x38] sm:$0xff]  }
 0xa25   :  { %v725_v52 = vadd.f32 %v724_v51, %v1525_v48  ;;  %v500_v48 = vadd.f32 %v1570_v60, %v1580_v3  ;;  %v1307_v51 = vld [vmem:[%s1719_s11 + $0x30] sm:$0xff]  }
 0xa26   :  { %v1245_v53 = vpop.f32.mrf.mxu0 }
 0xa27   :  { %v731_v54 = vsel %vm216_vm3, %v725_v52, -inf  ;;  %v1309_v53 = vld [vmem:[%s1719_s11 + $0x20] sm:$0xff]  }
 0xa28   :  { %732 = vmax.xlane.f32.xlu0 %v731_v54  ;;  %v1310_v54 = vld [vmem:[%s1719_s11 + $0x18] sm:$0xff]  }
 0xaad   :  { %v730_v55 = vpop.xlane.xlu1 %729 }
 0xaae   :  { %v734_v56 = vsub.f32 %v722_v47, %v730_v55  ;;  %v1304_v47 = vld [vmem:[%s1717_s9 + $0x8] sm:$0xff]  }
 0xab0   :  { %v736_v57 = vmul.f32 1.442695, %v734_v56 }
 0xab1   :  { %v733_v58 = vpop.xlane.xlu0 %732 }
 0xab2   :  { %1342 = vpow2.f32 %v736_v57  ;;  %v735_v59 = vsub.f32 %v725_v52, %v733_v58  ;;  %v1308_v52 = vld [vmem:[%s1719_s11 + $0x28] sm:$0xff]  }
 0xab4   :  { %v738_v61 = vmul.f32 1.442695, %v735_v59 }
 0xab6   :  { %1344 = vpow2.f32 %v738_v61 }
 0xabf   :  { %v1343_v44 = vpop.eup %1342 }
 0xac0   :  { %v740_v63 = vsel %vm216_vm3, %v1343_v44, 0.0 }
 0xac1   :  { %741 = vadd.xlane.f32.xlu0 %v740_v63 }
 0xac3   :  { %v1345_v2 = vpop.eup %1344 }
 0xac4   :  { %v743_v4 = vsel %vm216_vm3, %v1345_v2, 0.0 }
 0xac5   :  { %744 = vadd.xlane.f32.xlu1 %v743_v4 }
 0xad7   :  { %751 = vrot.lane.b32.xlu0 %v1503_v37, %s1388_s16 }
 0xadf   :  { %v668_v6 = vpop.f32.mrf.mxu1 }
 0xae0   :  { %v675_v7 = vadd.f32 %v668_v6, %v500_v48 }
 0xae1   :  { %v1238_v8 = vpop.f32.mrf.mxu1 }
 0xae3   :  { %v671_v10 = vpop.f32.mrf.mxu1 }
 0xae4   :  { %v676_v11 = vadd.f32 %v671_v10, %v503_v9 }
 0xae5   :  { %v1239_v12 = vpop.f32.mrf.mxu1 }
 0xae6   :  { %v1311_v12 = vld [vmem:[%s1719_s11 + $0x10] sm:$0xff]  }
 0xb4a   :  { %v742_v13 = vpop.xlane.xlu0 %741 }
 0xb4b   :  { %1346 = vrcp.f32 %v742_v13  ;;  %v1312_v13 = vld [vmem:[%s1719_s11 + $0x8] sm:$0xff]  }
 0xb4e   :  { %v745_v14 = vpop.xlane.xlu1 %744  ;;  %v752_v16 = vpop.permute.xlu0 %751 }
 0xb4f   :  { %1348 = vrcp.f32 %v745_v14  ;;  %1247 = vmatpush3.bf16.msra.mxu1 %v752_v16  ;;  %v1313_v14 = vld [vmem:[%s1719_s11] sm:$0xff]  }
 0xb50   :  { %1258 = vmatprep.subr.bf16.mxu1 %v1376_v15  ;;  %v1126_v16 = vld [vmem:[%s1718_s10] ss:$0 sm:$0xff]  ;;  %s1389_s10 = smov [#allocation2]  }
 0xb51   :  { %s1095_s11 = sshll.u32 %s1389_s10, 4  ;;  %s1096_s11 = int_to_ptr.vmem [resolvable:$true] %s1095_s11 }
 0xb52   :  { %s1354_s6 = scalar_lea.vmem %s1096_s11, 256  ;;  %p1359_p1 = scmp.lt.s32.totalorder %s1096_s11, %s1096_s11 }
 0xb53   :  { %p1355_p0 = scmp.ne.s32.totalorder %s1096_s11, %s1354_s6  ;;  %p1360_p2 = scmp.lt.s32.totalorder %s1354_s6, %s1354_s6 }
 0xb55   :  { %p1361_p3 = por %p1360_p2, %p1359_p1 }
 0xb57   :  { %p1362_p4 = pnand %p1361_p3, %p1355_p0 }
 0xb58   :  { %v1347_v37 = vpop.eup %1346 }
 0xb59   :  { %v748_v60 = vmul.f32 %v1347_v37, %v1343_v44 }
 0xb5c   :  { %v1349_v17 = vpop.eup %1348 }
 0xb5d   :  { %v749_v3 = vmul.f32 %v1349_v17, %v1345_v2  ;;  %v1124_v2 = vld [vmem:[%s1715_s7] ss:$0 sm:$0xff] }
 0xb5f   :  { %v750_v18 = vpack.c.bf16 %v749_v3, %v748_v60 }
 0xb61   :  { %1249 = vmatmul.mubr.msk.bf16.vlgmr.msra.gmra.mxu1 %vm216_vm3, %v750_v18 }
 0xb62   :  { %1262 = vmatprep.mubr.msk.bf16.mxu1 %vm1377_vm1, %v1376_v15  ;;  %1259 = vmatpush3.bf16.msra.mxu1 %v1304_v47 }
 0xb63   :  { %1260 = vmatprep.subr.bf16.mxu1 %v1376_v15 }
 0xb66   :  { %1261 = vmatpush3.bf16.msra.mxu1 %v1305_v49 }
 0xc21   :  { %v791_v19 = vpop.f32.mrf.mxu1 }
 0xc23   :  { %v1250_v20 = vpop.f32.mrf.mxu1 }
 0xc25   :  { %v794_v21 = vpop.f32.mrf.mxu1 }
 0xc26   :  { %v798_v22 = vpack.c.bf16 %v794_v21, %v791_v19 }
 0xc27   :  { %v1251_v23 = vpop.f32.mrf.mxu1 }
 0xc28   :  { %1255 = vmatmul.mubr.msk.bf16.vlgmr.msra.gmra.mxu0 %vm168_vm2, %v798_v22 }
 0xc29   :  { %1282 = vmatprep.mubr.msk.bf16.mxu0 %vm1377_vm1, %v1376_v15  ;;  %1267 = vmatpush3.bf16.msra.mxu0 %v1306_v50 }
 0xc2a   :  { %1268 = vmatprep.subr.bf16.mxu0 %v1376_v15 }
 0xc2d   :  { %1269 = vmatpush3.bf16.msra.mxu0 %v1307_v51 }
 0xc2e   :  { %1270 = vmatprep.subr.bf16.mxu0 %v1376_v15 }
 0xc31   :  { %1271 = vmatpush3.bf16.msra.mxu0 %v1308_v52 }
 0xc32   :  { %1272 = vmatprep.subr.bf16.mxu0 %v1376_v15 }
 0xc35   :  { %1273 = vmatpush3.bf16.msra.mxu0 %v1309_v53 }
 0xc36   :  { %1274 = vmatprep.subr.bf16.mxu0 %v1376_v15 }
 0xc39   :  { %1275 = vmatpush3.bf16.msra.mxu0 %v1310_v54 }
 0xc3a   :  { %1276 = vmatprep.subr.bf16.mxu0 %v1376_v15 }
 0xc3d   :  { %1277 = vmatpush3.bf16.msra.mxu0 %v1311_v12 }
 0xc3e   :  { %1278 = vmatprep.subr.bf16.mxu0 %v1376_v15 }
 0xc41   :  { %1279 = vmatpush3.bf16.msra.mxu0 %v1312_v13 }
 0xc42   :  { %1280 = vmatprep.subr.bf16.mxu0 %v1376_v15  ;;  %v1130_v15 = vld [vmem:[%s1720_s12] ss:$0 sm:$0xff] }
 0xc45   :  { %1281 = vmatpush3.bf16.msra.mxu0 %v1313_v14 }
 0xce8   :  { %v839_v24 = vpop.f32.mrf.mxu0 }
 0xce9   :  { %v846_v26 = vadd.f32 %v839_v24, %v675_v7  ;;  %v1125_v7 = vld [vmem:[%s1716_s8] ss:$0 sm:$0xff] }
 0xcea   :  { %v1256_v41 = vpop.f32.mrf.mxu0 }
 0xceb   :  { %v855_v27 = vadd.f32 %v1123_v25, %v846_v26 }
 0xcec   :  { %v842_v28 = vpop.f32.mrf.mxu0 }
 0xced   :  { %v1637_v29 = vadd.f32 %v855_v27, %v1465_v0  ;;  %v847_v30 = vadd.f32 %v842_v28, %v676_v11 }
 0xcee   :  { %v1257_v31 = vpop.f32.mrf.mxu0 }
 0xcef   :  { %v856_v32 = vadd.f32 %v1123_v25, %v847_v30  ;;  %v861_v33 = vsel %vm50_vm0, %v1637_v29, 0.0 }
 0xcf0   :  { %862 = vadd.xlane.f32.xlu1 %v861_v33 }
 0xcf1   :  { %v1642_v34 = vadd.f32 %v856_v32, %v1470_v1 }
 0xcf3   :  { %v864_v35 = vsel %vm50_vm0, %v1642_v34, 0.0 }
 0xcf4   :  { %865 = vadd.xlane.f32.xlu1 %v864_v35 }
 0xd79   :  { %v863_v36 = vpop.xlane.xlu1 %862 }
 0xd7a   :  { %v867_v38 = vmul.f32 0.03125, %v863_v36 }
 0xd7c   :  { %v869_v39 = vsub.f32 %v1637_v29, %v867_v38 }
 0xd7d   :  { %v866_v0 = vpop.xlane.xlu1 %865 }
 0xd7e   :  { %v868_v40 = vmul.f32 0.03125, %v866_v0  ;;  %v871_v42 = vmul.f32 %v869_v39, %v869_v39 }
 0xd80   :  { %v870_v43 = vsub.f32 %v1642_v34, %v868_v40  ;;  %v873_v45 = vsel %vm50_vm0, %v871_v42, 0.0 }
 0xd81   :  { %874 = vadd.xlane.f32.xlu1 %v873_v45 }
 0xd82   :  { %v872_v46 = vmul.f32 %v870_v43, %v870_v43 }
 0xd84   :  { %v876_v1 = vsel %vm50_vm0, %v872_v46, 0.0 }
 0xd85   :  { %877 = vadd.xlane.f32.xlu1 %v876_v1 }
 0xe0a   :  { %v875_v55 = vpop.xlane.xlu1 %874 }
 0xe0b   :  { %v879_v56 = vmul.f32 0.03125, %v875_v55 }
 0xe0d   :  { %v881_v57 = vadd.f32 1e-05, %v879_v56 }
 0xe0e   :  { %v878_v58 = vpop.xlane.xlu1 %877 }
 0xe0f   :  { %1350 = vrsqrt.f32 %v881_v57  ;;  %v880_v59 = vmul.f32 0.03125, %v878_v58 }
 0xe11   :  { %v882_v61 = vadd.f32 1e-05, %v880_v59 }
 0xe13   :  { %1352 = vrsqrt.f32 %v882_v61 }
 0xe1c   :  { %v1351_v44 = vpop.eup %1350 }
 0xe1d   :  { %v885_v63 = vmul.f32 %v1351_v44, %v869_v39 }
 0xe1f   :  { %v893_v6 = vmul.f32 %v1124_v2, %v885_v63 }
 0xe20   :  { %v1353_v4 = vpop.eup %1352 }
 0xe21   :  { %v886_v48 = vmul.f32 %v1353_v4, %v870_v43  ;;  %v901_v9 = vadd.f32 %v1125_v7, %v893_v6 }
 0xe23   :  { %v894_v8 = vmul.f32 %v1124_v2, %v886_v48 }
 0xe25   :  { %v902_v10 = vadd.f32 %v1125_v7, %v894_v8 }
 0xe27   :  { %v903_v11 = vpack.c.bf16 %v902_v10, %v901_v9 }
 0xe29   :  { %1263 = vmatmul.mubr.msk.bf16.vlgmr.msra.gmra.mxu1 %vm50_vm0, %v903_v11 }
 0xee9   :  { %v964_v37 = vpop.f32.mrf.mxu1 }
 0xeea   :  { %v965_v60 = vadd.f32 %v1126_v16, %v964_v37 }
 0xeeb   :  { %v1264_v17 = vpop.f32.mrf.mxu1 }
 0xeec   :  { %v971_v5 = vmax.f32 %v965_v60, 0.0 }
 0xeed   :  { %v967_v3 = vpop.f32.mrf.mxu1 }
 0xeee   :  { %v968_v18 = vadd.f32 %v1126_v16, %v967_v3 }
 0xeef   :  { %v1265_v62 = vpop.f32.mrf.mxu1 }
 0xef0   :  { %v972_v19 = vmax.f32 %v968_v18, 0.0 }
 0xef2   :  { %v973_v20 = vpack.c.bf16 %v972_v19, %v971_v5 }
 0xef4   :  { %1283 = vmatmul.mubr.bf16.vlgmr.msra.gmra.mxu0 %v973_v20 }
 0xfb4   :  { %v1079_v21 = vpop.f32.mrf.mxu0 }
 0xfb5   :  { %v1080_v22 = vadd.f32 %v1130_v15, %v1079_v21 }
 0xfb6   :  { %v1284_v23 = vpop.f32.mrf.mxu0 }
 0xfb7   :  { %v1086_v24 = vadd.f32 %v1080_v22, %v1637_v29 }
 0xfb8   :  { %v1082_v25 = vpop.f32.mrf.mxu0 }
 0xfb9   :  { %1088 = vst.msk [vmem:[#allocation2] sm:$0xff] %vm50_vm0, %v1086_v24  ;;  %v1083_v26 = vadd.f32 %v1130_v15, %v1082_v25 }
 0xfba   :  { %v1285_v41 = vpop.f32.mrf.mxu0 }
 0xfbb   :  { %v1087_v27 = vadd.f32 %v1083_v26, %v1642_v34 }
 0xfbd   :  { %1089 = vst.msk [vmem:[#allocation2 + $0x8] sm:$0xff] %vm50_vm0, %v1087_v27 }
 0xfbe   :  { %1365 = shalt.err (!%p1362_p4)
}
 0xfbf   :  { %s1390_s12 = smov 128   ;;  %s1391_s19 = smov 8  }
 0xfc0   :  { %1101 = dma.vmem_to_hbm [thread:$0]  %s1096_s11, 256, %s1721_s13, [#allocation3], %s1390_s12, %s1390_s12, %s1391_s19  }
 0xfc1   :  { %1374 = dma.done.wait [#allocation3], 256  }
 0xfc2   :  { %1375 = vsyncadd [#allocation3], 4294967040 }
 0xfc3   :  { %1105 = vsyncpa [#allocation3], 1 }

</bundles_post_ra>
